<compile_context>
chip_gen: v5e
topology: v5e:2x2
jax: 0.10.0
libtpu: 0.0.40
codegen_flags: <defaults>
</compile_context>

<pallas_src>
import jax
import jax.numpy as jnp
from jax import lax
from jax.experimental import pallas as pl
from jax.experimental.pallas import tpu as pltpu


def _features_linear_kernel(x_t_ref, table_t_ref, bias_ref, out_ref):
    """One grid step produces a (D, tb) lane-dense output tile.

    x_t_ref     : (F, tb) int32 — field-major indices for this batch tile
    table_t_ref : (D, V)  f32   — transposed embedding table (resident across grid)
    bias_ref    : (D, 1)  f32   — bias column (resident)
    out_ref     : (D, tb) f32   — output tile, batch packed into lanes
    """
    F, tb = x_t_ref.shape
    V = table_t_ref.shape[1]

    x = x_t_ref[...]                                          # (F, tb) int32, one load
    v_iota = lax.broadcasted_iota(jnp.int32, (V, tb), 0)      # row ids, hoisted

    # Multi-hot count matrix M[v, b] = #{f : x[b, f] == v}.  F is a small static
    # constant -> fully unrolled; each iteration is one full (V, tb) VPU compare+add,
    # keeping the intermediate footprint at a single (V, tb) buffer.
    m = jnp.zeros((V, tb), jnp.float32)
    for f in range(F):
        m = m + (v_iota == x[f:f + 1, :]).astype(jnp.float32)

    # Single MXU contraction over the vocabulary: (D, V) @ (V, tb) -> (D, tb).
    acc = jnp.dot(table_t_ref[...], m, preferred_element_type=jnp.float32)

    # One unmasked, full-tile, lane-dense store per grid step.
    out_ref[...] = acc + bias_ref[...]                        # (D, 1) broadcasts over lanes


def features_linear(x, table, bias, *, batch_tile=512):
    """FM linear term: out[b] = sum_f table[x[b, f]] + bias.

    x     : (B, F) integer indices (already offset into the global [0, V) range)
    table : (V, D) embedding table, V = sum(field_dims), D = output_dim
    bias  : (D,)   bias
    returns (B, D) float32
    """
    B, F = x.shape
    V, D = table.shape

    # Lane-dense batch tile: round up to a multiple of 128 lanes.
    tb = max(128, int(batch_tile))
    tb = ((tb + 127) // 128) * 128
    B_pad = ((B + tb - 1) // tb) * tb
    grid = (B_pad // tb,)

    # Field-major indices, padded along batch.  Padded columns hit row 0 and are
    # sliced off after the call.
    x_t = jnp.transpose(x.astype(jnp.int32))                  # (F, B)
    if B_pad != B:
        x_t = jnp.pad(x_t, ((0, 0), (0, B_pad - B)))

    table_t = jnp.transpose(table.astype(jnp.float32))        # (D, V)
    bias_col = bias.astype(jnp.float32).reshape(D, 1)

    # Scoped-VMEM sizing: resident table + bias plus per-tile index/output blocks,
    # x2 for default double buffering, padded to (8, 128) tiles, plus headroom.
    def _tile_bytes(r, c, itemsize=4):
        return (-(-r // 8) * 8) * (-(-c // 128) * 128) * itemsize

    vmem_needed = 2 * (_tile_bytes(D, V) + _tile_bytes(D, 1)
                       + _tile_bytes(F, tb) + _tile_bytes(D, tb))
    vmem_limit = int(min(64 * 1024 * 1024, max(4 * 1024 * 1024, 2 * vmem_needed)))

    out_t = pl.pallas_call(
        _features_linear_kernel,
        out_shape=jax.ShapeDtypeStruct((D, B_pad), jnp.float32),
        grid=grid,
        in_specs=[
            pl.BlockSpec((F, tb), lambda i: (0, i)),          # indices: one batch tile
            pl.BlockSpec((D, V), lambda i: (0, 0)),           # table:   resident in VMEM
            pl.BlockSpec((D, 1), lambda i: (0, 0)),           # bias:    resident in VMEM
        ],
        out_specs=pl.BlockSpec((D, tb), lambda i: (0, i)),    # lane-dense output tile
        compiler_params=pltpu.CompilerParams(
            dimension_semantics=("parallel",),
            vmem_limit_bytes=vmem_limit,
        ),
        cost_estimate=pl.CostEstimate(
            flops=2 * B_pad * V * D + B_pad * F * V,
            transcendentals=0,
            bytes_accessed=B_pad * F * 4 + V * D * 4 + D * 4 + B_pad * D * 4,
        ),
    )(x_t, table_t, bias_col)

    return jnp.transpose(out_t[:, :B])                        # (B, D)


if __name__ == "__main__":
    # Synthetic FeaturesLinear config (small shapes).
    field_dims = (10, 12, 8, 10)          # sum = 40 vocabulary rows
    output_dim = 1
    V = sum(field_dims)
    B, F = 2, len(field_dims)

    key = jax.random.PRNGKey(0)
    k_idx, k_emb = jax.random.split(key)

    # Deterministic parameter init (nn.Embedding ~ N(0,1); bias = zeros).
    table = jax.random.normal(k_emb, (V, output_dim), dtype=jnp.float32)
    bias = jnp.zeros((output_dim,), dtype=jnp.float32)

    # Indices already offset into the global [0, V) range (as the module expects).
    x = jax.random.randint(k_idx, (B, F), minval=0, maxval=V, dtype=jnp.int32)

    out = features_linear(x, table, bias)
    out = jax.block_until_ready(out)

    # Pure-JAX reference: sum of gathered embeddings over the field axis + bias.
    ref = jnp.sum(table[x], axis=1) + bias
    assert out.shape == (B, output_dim), out.shape
    assert jnp.allclose(out, ref, atol=1e-5, rtol=1e-5), (out, ref)

    print("KERNEL_OK")
</pallas_src>

<mosaic_0001>
module attributes {stable_mosaic.version = 11 : i64} {
  func.func @_features_linear_kernel(%arg0: i32, %arg1: memref<4x512xi32, #tpu.memory_space<vmem>>, %arg2: memref<1x40xf32, #tpu.memory_space<vmem>>, %arg3: memref<1x1xf32, #tpu.memory_space<vmem>>, %arg4: memref<1x512xf32, #tpu.memory_space<vmem>>) attributes {dimension_semantics = [#tpu.dimension_semantics<parallel>], iteration_bounds = array<i64: 1>, scalar_prefetch = 0 : i64, scratch_operands = 0 : i64, tpu.core_type = #tpu.core_type<tc>, window_params = [{transform_indices = @transform_0, window_bounds = array<i64: 4, 512>}, {pipeline_mode = #tpu.pipeline_mode<synchronous>, transform_indices = @transform_1, window_bounds = array<i64: 1, 40>}, {pipeline_mode = #tpu.pipeline_mode<synchronous>, transform_indices = @transform_2, window_bounds = array<i64: 1, 1>}, {transform_indices = @transform_3, window_bounds = array<i64: 1, 512>}]} {
    %c0 = arith.constant 0 : index
    %c0_0 = arith.constant 0 : index
    %0 = vector.load %arg1[%c0, %c0_0] : memref<4x512xi32, #tpu.memory_space<vmem>>, vector<4x512xi32>
    %1 = tpu.iota {dimensions = array<i32: 0>} : vector<40x512xi32>
    %cst = arith.constant 0.000000e+00 : f32
    %2 = vector.broadcast %cst : f32 to vector<40x512xf32>
    %3 = vector.extract_strided_slice %0 {offsets = [0, 0], sizes = [1, 512], strides = [1, 1]} : vector<4x512xi32> to vector<1x512xi32>
    %4 = vector.broadcast %3 : vector<1x512xi32> to vector<40x512xi32>
    %5 = arith.cmpi eq, %1, %4 : vector<40x512xi32>
    %6 = arith.extui %5 : vector<40x512xi1> to vector<40x512xi32>
    %7 = arith.sitofp %6 : vector<40x512xi32> to vector<40x512xf32>
    %8 = arith.addf %2, %7 : vector<40x512xf32>
    %9 = vector.extract_strided_slice %0 {offsets = [1, 0], sizes = [1, 512], strides = [1, 1]} : vector<4x512xi32> to vector<1x512xi32>
    %10 = vector.broadcast %9 : vector<1x512xi32> to vector<40x512xi32>
    %11 = arith.cmpi eq, %1, %10 : vector<40x512xi32>
    %12 = arith.extui %11 : vector<40x512xi1> to vector<40x512xi32>
    %13 = arith.sitofp %12 : vector<40x512xi32> to vector<40x512xf32>
    %14 = arith.addf %8, %13 : vector<40x512xf32>
    %15 = vector.extract_strided_slice %0 {offsets = [2, 0], sizes = [1, 512], strides = [1, 1]} : vector<4x512xi32> to vector<1x512xi32>
    %16 = vector.broadcast %15 : vector<1x512xi32> to vector<40x512xi32>
    %17 = arith.cmpi eq, %1, %16 : vector<40x512xi32>
    %18 = arith.extui %17 : vector<40x512xi1> to vector<40x512xi32>
    %19 = arith.sitofp %18 : vector<40x512xi32> to vector<40x512xf32>
    %20 = arith.addf %14, %19 : vector<40x512xf32>
    %21 = vector.extract_strided_slice %0 {offsets = [3, 0], sizes = [1, 512], strides = [1, 1]} : vector<4x512xi32> to vector<1x512xi32>
    %22 = vector.broadcast %21 : vector<1x512xi32> to vector<40x512xi32>
    %23 = arith.cmpi eq, %1, %22 : vector<40x512xi32>
    %24 = arith.extui %23 : vector<40x512xi1> to vector<40x512xi32>
    %25 = arith.sitofp %24 : vector<40x512xi32> to vector<40x512xf32>
    %26 = arith.addf %20, %25 : vector<40x512xf32>
    %c0_1 = arith.constant 0 : index
    %c0_2 = arith.constant 0 : index
    %27 = vector.load %arg2[%c0_1, %c0_2] : memref<1x40xf32, #tpu.memory_space<vmem>>, vector<1x40xf32>
    %cst_3 = arith.constant dense<0.000000e+00> : vector<1x512xf32>
    %28 = tpu.matmul %27, %26, %cst_3 {dimension_numbers = #tpu.dot_dimension_numbers<[1], [0], [0], [1], [0, 0, 1, 1], [], []>} : vector<1x40xf32>, vector<40x512xf32>, vector<1x512xf32> -> vector<1x512xf32>
    %c0_4 = arith.constant 0 : index
    %c0_5 = arith.constant 0 : index
    %29 = vector.load %arg3[%c0_4, %c0_5] : memref<1x1xf32, #tpu.memory_space<vmem>>, vector<1x1xf32>
    %30 = vector.broadcast %29 : vector<1x1xf32> to vector<1x512xf32>
    %31 = arith.addf %28, %30 : vector<1x512xf32>
    %c0_6 = arith.constant 0 : index
    %c0_7 = arith.constant 0 : index
    %32 = vector.load %arg4[%c0_6, %c0_7] : memref<1x512xf32, #tpu.memory_space<vmem>>, vector<1x512xf32>
    tpu.vector_store %arg4[%c0_6, %c0_7], %31 {strides = array<i32>} : memref<1x512xf32, #tpu.memory_space<vmem>>, vector<1x512xf32>,
    return
  }
  func.func @transform_0(%arg0: i32) -> (i32, i32) {
    %c0_i32 = arith.constant 0 : i32
    %c0_i32_0 = arith.constant 0 : i32
    return %c0_i32, %arg0 : i32, i32
  }
  func.func @transform_1(%arg0: i32) -> (i32, i32) {
    %c0_i32 = arith.constant 0 : i32
    %c0_i32_0 = arith.constant 0 : i32
    %c0_i32_1 = arith.constant 0 : i32
    return %c0_i32, %c0_i32_0 : i32, i32
  }
  func.func @transform_2(%arg0: i32) -> (i32, i32) {
    %c0_i32 = arith.constant 0 : i32
    %c0_i32_0 = arith.constant 0 : i32
    %c0_i32_1 = arith.constant 0 : i32
    return %c0_i32, %c0_i32_0 : i32, i32
  }
  func.func @transform_3(%arg0: i32) -> (i32, i32) {
    %c0_i32 = arith.constant 0 : i32
    %c0_i32_0 = arith.constant 0 : i32
    return %c0_i32, %arg0 : i32, i32
  }
}

</mosaic_0001>

<bundles_post_ra>
// kernel: tpu_custom_call.1
= control target key start
LH: loop header
LB: loop body
LE: loop exit
PB: predicated region body
PF: predicated region fallthrough
CT: control target
= control target key end

     0   :  { %s1004_s0 = inlined_call_operand.hbm [shape: s32[4,512], index: 0, kind: input, shape index: {}]   ;;  %s1005_s1 = inlined_call_operand.vmem [shape: f32[1,40], index: 1, kind: input, shape index: {}]   ;;  %s1006_s2 = inlined_call_operand.<no memory space> [shape: f32[1,1], index: 2, kind: input, shape index: {}]   ;;  %s1007_s3 = inlined_call_operand.hbm [shape: f32[1,512], index: 3, kind: output, shape index: {}]  }
   0x1   :  { %v8_v0 = vstv %s1006_s2 }
   0x2   :  { %9 = vst [vmem:[#allocation2] sm:$0x1] %v8_v0 }
   0x3   :  { %10 = vsyncpa [#allocation4], 0 }
   0x4   :  { %11 = vsyncpa [#allocation5], 0  ;;  %s17_s16 = sshll.u32 %s1004_s0, 4  ;;  %s660_s17 = smov [#allocation3]   ;;  %s18_s16 = int_to_ptr.hbm [resolvable:$true] %s17_s16 }
   0x5   :  { %s19_s18 = sshll.u32 %s660_s17, 4  ;;  %s20_s18 = int_to_ptr.vmem [resolvable:$true] %s19_s18 }
   0x6   :  { %22 = dma.hbm_to_vmem [thread:$0]  %s18_s16, 256, %s20_s18, [#allocation4]  }
   0x7   :  { %656 = dma.done.wait [#allocation4], 256  }
   0x8   :  { %657 = vsyncadd [#allocation4], 4294967040  ;;  %v33_v1 = vlaneseq  ;;  %v32_v3 = vld [vmem:[#allocation3 + $0x8] sm:$0xff]  ;;  %v661_v23 = vmov 0.0   ;;  %v758_v42 = vld [vmem:[#allocation3] sm:$0xff]  ;;  %s509_s22 = sshll.u32 %s1007_s3, 4  ;;  %s510_s22 = int_to_ptr.hbm [resolvable:$true] %s509_s22 }
   0x9   :  { %v41_v7 = vperm.slane %v32_v3, 0  ;;  %v129_v8 = vperm.slane %v32_v3, 1  ;;  %v217_v9 = vperm.slane %v32_v3, 2  ;;  %v305_v10 = vperm.slane %v32_v3, 3 }
   0xa   :  { %v691_v2 = vshrl.u32 %v33_v1, 7  ;;  %v42_v11 = vperm.slane %v32_v3, 4  ;;  %v130_v12 = vperm.slane %v32_v3, 5  ;;  %v218_v13 = vperm.slane %v32_v3, 6 }
   0xb   :  { %v306_v14 = vperm.slane %v32_v3, 7  ;;  %v702_v15 = vperm.slane %v41_v7, 0  ;;  %v704_v16 = vperm.slane %v129_v8, 1  ;;  %v706_v17 = vperm.slane %v217_v9, 2 }
   0xc   :  { %v694_v4 = vadd.s32 32, %v691_v2  ;;  %v697_v5 = vadd.s32 24, %v691_v2  ;;  %v700_v6 = vadd.s32 16, %v691_v2  ;;  %v708_v18 = vperm.slane %v305_v10, 3 }
   0xd   :  { %v710_v19 = vperm.slane %v42_v11, 0  ;;  %v712_v20 = vperm.slane %v130_v12, 1  ;;  %v714_v21 = vperm.slane %v218_v13, 2  ;;  %v716_v22 = vperm.slane %v306_v14, 3 }
   0xe   :  { %vm65_vm0 = vcmp.eq.s32.totalorder %v694_v4, %v702_v15  ;;  %vm153_vm1 = vcmp.eq.s32.totalorder %v694_v4, %v704_v16  ;;  %vm241_vm2 = vcmp.eq.s32.totalorder %v694_v4, %v706_v17  ;;  %vm329_vm3 = vcmp.eq.s32.totalorder %v694_v4, %v708_v18 }
   0xf   :  { %v537_v24 = vsel %vm65_vm0, 1.0, %v661_v23  ;;  %v557_v25 = vsel %vm153_vm1, 1.0, %v661_v23  ;;  %v577_v26 = vsel %vm241_vm2, 1.0, %v661_v23  ;;  %v597_v27 = vsel %vm329_vm3, 1.0, %v661_v23 }
  0x10   :  { %v213_v28 = vadd.f32 %v557_v25, %v537_v24  ;;  %vm66_vm4 = vcmp.eq.s32.totalorder %v694_v4, %v710_v19  ;;  %vm154_vm5 = vcmp.eq.s32.totalorder %v694_v4, %v712_v20  ;;  %vm242_vm6 = vcmp.eq.s32.totalorder %v694_v4, %v714_v21 }
  0x11   :  { %v538_v29 = vsel %vm66_vm4, 1.0, %v661_v23  ;;  %v558_v30 = vsel %vm154_vm5, 1.0, %v661_v23  ;;  %v578_v31 = vsel %vm242_vm6, 1.0, %v661_v23  ;;  %vm330_vm7 = vcmp.eq.s32.totalorder %v694_v4, %v716_v22 }
  0x12   :  { %v301_v32 = vadd.f32 %v577_v26, %v213_v28  ;;  %v214_v33 = vadd.f32 %v558_v30, %v538_v29  ;;  %v598_v34 = vsel %vm330_vm7, 1.0, %v661_v23  ;;  %vm61_vm8 = vcmp.eq.s32.totalorder %v697_v5, %v702_v15 }
  0x13   :  { %v533_v35 = vsel %vm61_vm8, 1.0, %v661_v23  ;;  %vm149_vm9 = vcmp.eq.s32.totalorder %v697_v5, %v704_v16  ;;  %vm237_vm10 = vcmp.eq.s32.totalorder %v697_v5, %v706_v17  ;;  %vm325_vm11 = vcmp.eq.s32.totalorder %v697_v5, %v708_v18 }
  0x14   :  { %v389_v36 = vadd.f32 %v597_v27, %v301_v32  ;;  %v302_v37 = vadd.f32 %v578_v31, %v214_v33  ;;  %v553_v38 = vsel %vm149_vm9, 1.0, %v661_v23  ;;  %v573_v39 = vsel %vm237_vm10, 1.0, %v661_v23 }
  0x15   :  { %v209_v40 = vadd.f32 %v553_v38, %v533_v35  ;;  %v593_v41 = vsel %vm325_vm11, 1.0, %v661_v23  ;;  %vm62_vm12 = vcmp.eq.s32.totalorder %v697_v5, %v710_v19  ;;  %vm150_vm13 = vcmp.eq.s32.totalorder %v697_v5, %v712_v20 }
  0x16   :  { %454 = vmatpush.msra.mxu2 %v389_v36  ;;  %v390_v43 = vadd.f32 %v598_v34, %v302_v37  ;;  %v534_v44 = vsel %vm62_vm12, 1.0, %v661_v23  ;;  %v554_v45 = vsel %vm150_vm13, 1.0, %v661_v23  ;;  %vm238_vm14 = vcmp.eq.s32.totalorder %v697_v5, %v714_v21 }
  0x17   :  { %v297_v46 = vadd.f32 %v573_v39, %v209_v40  ;;  %v210_v47 = vadd.f32 %v554_v45, %v534_v44  ;;  %v574_v48 = vsel %vm238_vm14, 1.0, %v661_v23  ;;  %vm326_vm15 = vcmp.eq.s32.totalorder %v697_v5, %v716_v22 }
  0x18   :  { %474 = vmatpush.msra.mxu3 %v390_v43  ;;  %v594_v49 = vsel %vm326_vm15, 1.0, %v661_v23  ;;  %v40_v50 = vperm.slane %v758_v42, 4  ;;  %v128_v51 = vperm.slane %v758_v42, 5  ;;  %v216_v52 = vperm.slane %v758_v42, 6 }
  0x19   :  { %v385_v53 = vadd.f32 %v593_v41, %v297_v46  ;;  %v298_v54 = vadd.f32 %v574_v48, %v210_v47  ;;  %v304_v55 = vperm.slane %v758_v42, 7  ;;  %vm57_vm0 = vcmp.eq.s32.totalorder %v700_v6, %v702_v15 }
  0x1a   :  { %v774_v56 = vperm.slane %v40_v50, 0  ;;  %v776_v57 = vperm.slane %v128_v51, 1  ;;  %v778_v58 = vperm.slane %v216_v52, 2  ;;  %v529_v59 = vsel %vm57_vm0, 1.0, %v661_v23 }
  0x1b   :  { %455 = vmatpush.msra.mxu2 %v385_v53  ;;  %v386_v60 = vadd.f32 %v594_v49, %v298_v54  ;;  %v781_v61 = vperm.slane %v304_v55, 3  ;;  %vm145_vm1 = vcmp.eq.s32.totalorder %v700_v6, %v704_v16  ;;  %vm233_vm2 = vcmp.eq.s32.totalorder %v700_v6, %v706_v17 }
  0x1c   :  { %vm64_vm3 = vcmp.eq.s32.totalorder %v694_v4, %v774_v56  ;;  %vm152_vm4 = vcmp.eq.s32.totalorder %v694_v4, %v776_v57  ;;  %vm240_vm5 = vcmp.eq.s32.totalorder %v694_v4, %v778_v58  ;;  %v549_v62 = vsel %vm145_vm1, 1.0, %v661_v23 }
  0x1d   :  { %475 = vmatpush.msra.mxu3 %v386_v60  ;;  %v536_v63 = vsel %vm64_vm3, 1.0, %v661_v23  ;;  %v556_v0 = vsel %vm152_vm4, 1.0, %v661_v23  ;;  %v576_v3 = vsel %vm240_vm5, 1.0, %v661_v23  ;;  %vm328_vm6 = vcmp.eq.s32.totalorder %v694_v4, %v781_v61 }
  0x1e   :  { %v212_v7 = vadd.f32 %v556_v0, %v536_v63  ;;  %v596_v8 = vsel %vm328_vm6, 1.0, %v661_v23  ;;  %v205_v9 = vadd.f32 %v549_v62, %v529_v59  ;;  %v569_v10 = vsel %vm233_vm2, 1.0, %v661_v23 }
  0x1f   :  { %vm321_vm7 = vcmp.eq.s32.totalorder %v700_v6, %v708_v18  ;;  %vm58_vm8 = vcmp.eq.s32.totalorder %v700_v6, %v710_v19  ;;  %vm146_vm9 = vcmp.eq.s32.totalorder %v700_v6, %v712_v20  ;;  %vm234_vm10 = vcmp.eq.s32.totalorder %v700_v6, %v714_v21 }
  0x20   :  { %v300_v11 = vadd.f32 %v576_v3, %v212_v7  ;;  %v293_v12 = vadd.f32 %v569_v10, %v205_v9  ;;  %v589_v13 = vsel %vm321_vm7, 1.0, %v661_v23  ;;  %v530_v14 = vsel %vm58_vm8, 1.0, %v661_v23 }
  0x21   :  { %v550_v24 = vsel %vm146_vm9, 1.0, %v661_v23  ;;  %v570_v25 = vsel %vm234_vm10, 1.0, %v661_v23  ;;  %vm322_vm11 = vcmp.eq.s32.totalorder %v700_v6, %v716_v22  ;;  %v39_v26 = vperm.slane %v758_v42, 0 }
  0x22   :  { %v388_v27 = vadd.f32 %v596_v8, %v300_v11  ;;  %v381_v28 = vadd.f32 %v589_v13, %v293_v12  ;;  %v206_v29 = vadd.f32 %v550_v24, %v530_v14  ;;  %v590_v30 = vsel %vm322_vm11, 1.0, %v661_v23 }
  0x23   :  { %v817_v31 = vperm.slane %v39_v26, 0  ;;  %v127_v32 = vperm.slane %v758_v42, 1  ;;  %v215_v33 = vperm.slane %v758_v42, 2  ;;  %v303_v34 = vperm.slane %v758_v42, 3 }
  0x24   :  { %434 = vmatpush.msra.mxu1 %v388_v27  ;;  %456 = vmatpush.msra.mxu2 %v381_v28  ;;  %v294_v35 = vadd.f32 %v570_v25, %v206_v29  ;;  %vm60_vm12 = vcmp.eq.s32.totalorder %v697_v5, %v774_v56  ;;  %vm148_vm13 = vcmp.eq.s32.totalorder %v697_v5, %v776_v57  ;;  %v827_v36 = vadd.s32 8, %v691_v2 }
  0x25   :  { %vm63_vm14 = vcmp.eq.s32.totalorder %v694_v4, %v817_v31  ;;  %v831_v37 = vperm.slane %v127_v32, 1  ;;  %v833_v38 = vperm.slane %v215_v33, 2  ;;  %v835_v39 = vperm.slane %v303_v34, 3 }
  0x26   :  { %v382_v40 = vadd.f32 %v590_v30, %v294_v35  ;;  %v535_v41 = vsel %vm63_vm14, 1.0, %v661_v23  ;;  %v532_v42 = vsel %vm60_vm12, 1.0, %v661_v23  ;;  %v552_v43 = vsel %vm148_vm13, 1.0, %v661_v23 }
  0x27   :  { %vm151_vm15 = vcmp.eq.s32.totalorder %v694_v4, %v831_v37  ;;  %vm239_vm0 = vcmp.eq.s32.totalorder %v694_v4, %v833_v38  ;;  %vm327_vm1 = vcmp.eq.s32.totalorder %v694_v4, %v835_v39  ;;  %v208_v44 = vadd.f32 %v552_v43, %v532_v42 }
  0x28   :  { %476 = vmatpush.msra.mxu3 %v382_v40  ;;  %v555_v45 = vsel %vm151_vm15, 1.0, %v661_v23  ;;  %v575_v46 = vsel %vm239_vm0, 1.0, %v661_v23  ;;  %v595_v47 = vsel %vm327_vm1, 1.0, %v661_v23  ;;  %vm236_vm2 = vcmp.eq.s32.totalorder %v697_v5, %v778_v58 }
  0x29   :  { %v211_v48 = vadd.f32 %v555_v45, %v535_v41  ;;  %v572_v49 = vsel %vm236_vm2, 1.0, %v661_v23  ;;  %vm324_vm3 = vcmp.eq.s32.totalorder %v697_v5, %v781_v61  ;;  %vm53_vm4 = vcmp.eq.s32.totalorder %v827_v36, %v702_v15 }
  0x2a   :  { %v296_v4 = vadd.f32 %v572_v49, %v208_v44  ;;  %v592_v50 = vsel %vm324_vm3, 1.0, %v661_v23  ;;  %v525_v51 = vsel %vm53_vm4, 1.0, %v661_v23  ;;  %vm141_vm5 = vcmp.eq.s32.totalorder %v827_v36, %v704_v16 }
  0x2b   :  { %v299_v52 = vadd.f32 %v575_v46, %v211_v48  ;;  %v545_v53 = vsel %vm141_vm5, 1.0, %v661_v23  ;;  %vm229_vm6 = vcmp.eq.s32.totalorder %v827_v36, %v706_v17  ;;  %vm317_vm7 = vcmp.eq.s32.totalorder %v827_v36, %v708_v18  ;;  %v939_v46 = vld [vmem:[%s1005_s1] sm:$0x1]  ;;  %s663_s1 = smov [#allocation6]  }
  0x2c   :  { %v384_v54 = vadd.f32 %v592_v50, %v296_v4  ;;  %v201_v55 = vadd.f32 %v545_v53, %v525_v51  ;;  %v565_v59 = vsel %vm229_vm6, 1.0, %v661_v23  ;;  %v585_v60 = vsel %vm317_vm7, 1.0, %v661_v23  ;;  %s507_s19 = sshll.u32 %s663_s1, 4  ;;  %s508_s19 = int_to_ptr.vmem [resolvable:$true] %s507_s19 }
  0x2d   :  { %v387_v62 = vadd.f32 %v595_v47, %v299_v52  ;;  %vm54_vm8 = vcmp.eq.s32.totalorder %v827_v36, %v710_v19  ;;  %vm142_vm9 = vcmp.eq.s32.totalorder %v827_v36, %v712_v20  ;;  %vm230_vm10 = vcmp.eq.s32.totalorder %v827_v36, %v714_v21 }
  0x2e   :  { %435 = vmatpush.msra.mxu1 %v384_v54  ;;  %v289_v63 = vadd.f32 %v565_v59, %v201_v55  ;;  %v526_v0 = vsel %vm54_vm8, 1.0, %v661_v23  ;;  %v546_v3 = vsel %vm142_vm9, 1.0, %v661_v23  ;;  %v566_v7 = vsel %vm230_vm10, 1.0, %v661_v23 }
  0x2f   :  { %414 = vmatpush.msra.mxu0 %v387_v62  ;;  %v202_v8 = vadd.f32 %v546_v3, %v526_v0  ;;  %vm318_vm11 = vcmp.eq.s32.totalorder %v827_v36, %v716_v22  ;;  %vm59_vm12 = vcmp.eq.s32.totalorder %v697_v5, %v817_v31  ;;  %vm147_vm13 = vcmp.eq.s32.totalorder %v697_v5, %v831_v37 }
  0x30   :  { %v377_v9 = vadd.f32 %v585_v60, %v289_v63  ;;  %v586_v10 = vsel %vm318_vm11, 1.0, %v661_v23  ;;  %v531_v11 = vsel %vm59_vm12, 1.0, %v661_v23  ;;  %v551_v12 = vsel %vm147_vm13, 1.0, %v661_v23 }
  0x31   :  { %v290_v13 = vadd.f32 %v566_v7, %v202_v8  ;;  %v207_v14 = vadd.f32 %v551_v12, %v531_v11  ;;  %vm235_vm14 = vcmp.eq.s32.totalorder %v697_v5, %v833_v38  ;;  %vm323_vm15 = vcmp.eq.s32.totalorder %v697_v5, %v835_v39 }
  0x32   :  { %457 = vmatpush.msra.mxu2 %v377_v9  ;;  %v571_v24 = vsel %vm235_vm14, 1.0, %v661_v23  ;;  %v591_v25 = vsel %vm323_vm15, 1.0, %v661_v23  ;;  %vm56_vm0 = vcmp.eq.s32.totalorder %v700_v6, %v774_v56  ;;  %vm144_vm1 = vcmp.eq.s32.totalorder %v700_v6, %v776_v57 }
  0x33   :  { %v378_v26 = vadd.f32 %v586_v10, %v290_v13  ;;  %v295_v27 = vadd.f32 %v571_v24, %v207_v14  ;;  %v528_v28 = vsel %vm56_vm0, 1.0, %v661_v23  ;;  %v548_v29 = vsel %vm144_vm1, 1.0, %v661_v23  ;;  %v392_v24 = vld [vmem:[#allocation2] sm:$0x1] }
  0x34   :  { %v204_v30 = vadd.f32 %v548_v29, %v528_v28  ;;  %vm232_vm2 = vcmp.eq.s32.totalorder %v700_v6, %v778_v58  ;;  %vm320_vm3 = vcmp.eq.s32.totalorder %v700_v6, %v781_v61  ;;  %vm49_vm4 = vcmp.eq.s32.totalorder %v691_v2, %v702_v15 }
  0x35   :  { %vm399_vm5 = vcmask 326656   ;;  %477 = vmatpush.msra.mxu3 %v378_v26  ;;  %v383_v5 = vadd.f32 %v591_v25, %v295_v27  ;;  %v568_v32 = vsel %vm232_vm2, 1.0, %v661_v23  ;;  %v588_v33 = vsel %vm320_vm3, 1.0, %v661_v23 }
  0x36   :  { %v521_v34 = vsel %vm49_vm4, 1.0, %v661_v23  ;;  %v292_v35 = vadd.f32 %v568_v32, %v204_v30  ;;  %vm137_vm6 = vcmp.eq.s32.totalorder %v691_v2, %v704_v16  ;;  %vm225_vm7 = vcmp.eq.s32.totalorder %v691_v2, %v706_v17 }
  0x37   :  { %vm313_vm8 = vcmp.eq.s32.totalorder %v691_v2, %v708_v18  ;;  %415 = vmatpush.msra.mxu0 %v383_v5  ;;  %v541_v15 = vsel %vm137_vm6, 1.0, %v661_v23  ;;  %v561_v40 = vsel %vm225_vm7, 1.0, %v661_v23  ;;  %vm50_vm9 = vcmp.eq.s32.totalorder %v691_v2, %v710_v19 }
  0x38   :  { %v581_v41 = vsel %vm313_vm8, 1.0, %v661_v23  ;;  %v380_v42 = vadd.f32 %v588_v33, %v292_v35  ;;  %v197_v43 = vadd.f32 %v541_v15, %v521_v34  ;;  %v522_v16 = vsel %vm50_vm9, 1.0, %v661_v23 }
  0x39   :  { %vm138_vm10 = vcmp.eq.s32.totalorder %v691_v2, %v712_v20  ;;  %vm226_vm11 = vcmp.eq.s32.totalorder %v691_v2, %v714_v21  ;;  %vm314_vm12 = vcmp.eq.s32.totalorder %v691_v2, %v716_v22  ;;  %vm55_vm13 = vcmp.eq.s32.totalorder %v700_v6, %v817_v31 }
  0x3a   :  { %v542_v17 = vsel %vm138_vm10, 1.0, %v661_v23  ;;  %436 = vmatpush.msra.mxu1 %v380_v42  ;;  %v285_v18 = vadd.f32 %v561_v40, %v197_v43  ;;  %v562_v44 = vsel %vm226_vm11, 1.0, %v661_v23  ;;  %v582_v45 = vsel %vm314_vm12, 1.0, %v661_v23 }
  0x3b   :  { %v198_v19 = vadd.f32 %v542_v17, %v522_v16  ;;  %v527_v20 = vsel %vm55_vm13, 1.0, %v661_v23  ;;  %vm143_vm14 = vcmp.eq.s32.totalorder %v700_v6, %v831_v37  ;;  %vm231_vm15 = vcmp.eq.s32.totalorder %v700_v6, %v833_v38 }
  0x3c   :  { %vm319_vm0 = vcmp.eq.s32.totalorder %v700_v6, %v835_v39  ;;  %v373_v21 = vadd.f32 %v581_v41, %v285_v18  ;;  %v547_v47 = vsel %vm143_vm14, 1.0, %v661_v23  ;;  %v567_v48 = vsel %vm231_vm15, 1.0, %v661_v23 }
  0x3d   :  { %v286_v22 = vadd.f32 %v562_v44, %v198_v19  ;;  %v203_v49 = vadd.f32 %v547_v47, %v527_v20  ;;  %v587_v4 = vsel %vm319_vm0, 1.0, %v661_v23  ;;  %vm52_vm1 = vcmp.eq.s32.totalorder %v827_v36, %v774_v56 }
  0x3e   :  { %vm140_vm2 = vcmp.eq.s32.totalorder %v827_v36, %v776_v57  ;;  %458 = vmatpush.msra.mxu2 %v373_v21  ;;  %v524_v50 = vsel %vm52_vm1, 1.0, %v661_v23  ;;  %vm228_vm3 = vcmp.eq.s32.totalorder %v827_v36, %v778_v58  ;;  %vm316_vm4 = vcmp.eq.s32.totalorder %v827_v36, %v781_v61 }
  0x3f   :  { %v374_v6 = vadd.f32 %v582_v45, %v286_v22  ;;  %v544_v51 = vsel %vm140_vm2, 1.0, %v661_v23  ;;  %601 = vmatmul.msk.f32.vlgmr.msra.gmra.mxu2 %vm399_vm5, %v939_v46  ;;  %v291_v52 = vadd.f32 %v567_v48, %v203_v49  ;;  %v564_v54 = vsel %vm228_vm3, 1.0, %v661_v23 }
  0x40   :  { %v200_v53 = vadd.f32 %v544_v51, %v524_v50  ;;  %v584_v55 = vsel %vm316_vm4, 1.0, %v661_v23  ;;  %vm51_vm6 = vcmp.eq.s32.totalorder %v827_v36, %v817_v31  ;;  %vm139_vm7 = vcmp.eq.s32.totalorder %v827_v36, %v831_v37 }
  0x41   :  { %478 = vmatpush.msra.mxu3 %v374_v6  ;;  %vm227_vm8 = vcmp.eq.s32.totalorder %v827_v36, %v833_v38  ;;  %v379_v59 = vadd.f32 %v587_v4, %v291_v52  ;;  %v523_v62 = vsel %vm51_vm6, 1.0, %v661_v23  ;;  %v543_v63 = vsel %vm139_vm7, 1.0, %v661_v23 }
  0x42   :  { %602 = vmatmul.msk.f32.vlgmr.msra.gmra.mxu3 %vm399_vm5, %v939_v46  ;;  %v288_v60 = vadd.f32 %v564_v54, %v200_v53  ;;  %v199_v0 = vadd.f32 %v543_v63, %v523_v62  ;;  %v563_v3 = vsel %vm227_vm8, 1.0, %v661_v23  ;;  %vm315_vm9 = vcmp.eq.s32.totalorder %v827_v36, %v835_v39 }
  0x43   :  { %vm48_vm10 = vcmp.eq.s32.totalorder %v691_v2, %v774_v56  ;;  %416 = vmatpush.msra.mxu0 %v379_v59  ;;  %v583_v8 = vsel %vm315_vm9, 1.0, %v661_v23  ;;  %vm136_vm11 = vcmp.eq.s32.totalorder %v691_v2, %v776_v57  ;;  %vm224_vm12 = vcmp.eq.s32.totalorder %v691_v2, %v778_v58 }
  0x44   :  { %v376_v7 = vadd.f32 %v584_v55, %v288_v60  ;;  %v520_v9 = vsel %vm48_vm10, 1.0, %v661_v23  ;;  %v287_v10 = vadd.f32 %v563_v3, %v199_v0  ;;  %v540_v11 = vsel %vm136_vm11, 1.0, %v661_v23 }
  0x45   :  { %vm312_vm13 = vcmp.eq.s32.totalorder %v691_v2, %v781_v61  ;;  %v196_v56 = vadd.f32 %v540_v11, %v520_v9  ;;  %v560_v36 = vsel %vm224_vm12, 1.0, %v661_v23  ;;  %vm47_vm14 = vcmp.eq.s32.totalorder %v691_v2, %v817_v31 }
  0x46   :  { %437 = vmatpush.msra.mxu1 %v376_v7  ;;  %v580_v12 = vsel %vm312_vm13, 1.0, %v661_v23  ;;  %v375_v13 = vadd.f32 %v583_v8, %v287_v10  ;;  %v519_v57 = vsel %vm47_vm14, 1.0, %v661_v23  ;;  %vm135_vm15 = vcmp.eq.s32.totalorder %v691_v2, %v831_v37 }
  0x47   :  { %vm223_vm0 = vcmp.eq.s32.totalorder %v691_v2, %v833_v38  ;;  %v284_v58 = vadd.f32 %v560_v36, %v196_v56  ;;  %v539_v61 = vsel %vm135_vm15, 1.0, %v661_v23  ;;  %vm311_vm1 = vcmp.eq.s32.totalorder %v691_v2, %v835_v39 }
  0x48   :  { %v559_v14 = vsel %vm223_vm0, 1.0, %v661_v23  ;;  %417 = vmatpush.msra.mxu0 %v375_v13  ;;  %v195_v31 = vadd.f32 %v539_v61, %v519_v57  ;;  %v579_v26 = vsel %vm311_vm1, 1.0, %v661_v23  ;;  %v662_v27 = vmov 0  }
  0x49   :  { %v372_v25 = vadd.f32 %v580_v12, %v284_v58  ;;  %607 = vset.pattern.permute.xlu0 %v662_v27  ;;  %vm492_vm2 = vcmask 1042434   ;;  %vm490_vm3 = vcmask 1040384   ;;  %vm499_vm4 = vcmp.lt.s32.totalorder %v33_v1, 512 }
  0x4a   :  { %v283_v37 = vadd.f32 %v559_v14, %v195_v31  ;;  %395 = vperm.xlu0 %607, %v392_v24  }
  0x4b   :  { %438 = vmatpush.msra.mxu1 %v372_v25 }
  0x4c   :  { %600 = vmatmul.msk.f32.vlgmr.msra.gmra.mxu1 %vm399_vm5, %v939_v46  ;;  %v371_v38 = vadd.f32 %v579_v26, %v283_v37 }
  0x4e   :  { %418 = vmatpush.msra.mxu0 %v371_v38 }
  0x4f   :  { %599 = vmatmul.msk.f32.vlgmr.msra.gmra.mxu0 %vm399_vm5, %v939_v46  ;;  %vm494_vm5 = vcmask 1041408  }
  0xbc   :  { %v396_v2 = vpop.permute.xlu0 %395 }
  0xbd   :  { %v398_v28 = vperm.slane %v396_v2, 0 }
  0xc2   :  { %v460_v39 = vpop.f32.mrf.mxu2 }
  0xc3   :  { %v461_v30 = vadd.f32 %v460_v39, %v398_v28 }
  0xc5   :  { %v480_v29 = vpop.f32.mrf.mxu3  ;;  %v488_v32 = vrot.slane %v461_v30, 6 }
  0xc6   :  { %v481_v5 = vadd.f32 %v480_v29, %v398_v28 }
  0xc8   :  { %v489_v33 = vrot.slane %v481_v5, 5 }
  0xc9   :  { %v440_v23 = vpop.f32.mrf.mxu1 }
  0xca   :  { %v441_v34 = vadd.f32 %v440_v23, %v398_v28  ;;  %v493_v41 = vsel %vm492_vm2, %v488_v32, %v489_v33 }
  0xcc   :  { %v487_v35 = vrot.slane %v441_v34, 7  ;;  %v420_v15 = vpop.f32.mrf.mxu0 }
  0xcd   :  { %v421_v40 = vadd.f32 %v420_v15, %v398_v28 }
  0xcf   :  { %v491_v42 = vsel %vm490_vm3, %v421_v40, %v487_v35 }
  0xd0   :  { %v495_v43 = vsel %vm494_vm5, %v491_v42, %v493_v41 }
  0xd1   :  { %501 = vst.msk [vmem:[#allocation6] sm:$0xf] %vm499_vm4, %v495_v43 }
  0xd2   :  { %512 = dma.vmem_to_hbm [thread:$0]  %s508_s19, 64, %s510_s22, [#allocation5]  }
  0xd3   :  { %658 = dma.done.wait [#allocation5], 64  }
  0xd4   :  { %659 = vsyncadd [#allocation5], 4294967232 }
  0xd5   :  { %517 = vsyncpa [#allocation4], 1 }
  0xd6   :  { %518 = vsyncpa [#allocation5], 1 }

</bundles_post_ra>
